<compile_context>
chip_gen: v6e
topology: v6e:2x2x1
jax: 0.10.0
libtpu: 0.0.40
codegen_flags: <defaults>
</compile_context>

<pallas_src>
import functools

import jax
import jax.numpy as jnp
from jax.experimental import pallas as pl
from jax.experimental.pallas import tpu as pltpu


def _ru(x, m):
    return (x + m - 1) // m * m


def _pass1_vmem_estimate(th, wo, c4, cout):
    ws = wo + 1
    c4l = _ru(c4, 128)
    col = _ru(cout, 128)
    m = th * wo
    return (2 * th * ws * c4l * 2        # main s2d block, double-buffered, bf16
            + 2 * ws * c4l * 2           # boundary-row block
            + 2 * 4 * c4 * col * 2       # weight cells, double-buffered, bf16
            + 2 * m * col * 2            # y output block, double-buffered, bf16
            + 2 * 2 * col * 4            # stats output block
            + (th + 1) * ws * c4l * 2    # slab scratch
            + 2 * col * 4                # stats scratch
            + 2 * m * c4l * 2            # assembled patch-tile temporaries
            + 3 * m * col * 4)           # f32 accumulator + elementwise temps


def _pick_tile_h(ho, wo, c4, cout, budget):
    """Largest divisor of Ho whose pass-1 working set fits the VMEM budget."""
    cand = (ho, _pass1_vmem_estimate(ho, wo, c4, cout))
    for th in sorted((d for d in range(1, ho + 1) if ho % d == 0), reverse=True):
        m = th * wo
        if (m % 8 != 0) and (m != ho * wo):      # (tr, C) block needs tr % 8 == 0 or full
            continue
        est = _pass1_vmem_estimate(th, wo, c4, cout)
        cand = (th, est)
        if est <= budget:
            return th, est
    return cand


def _pick_tile_rows(m_total, c, budget):
    """Largest divisor of Ho*Wo for pass 2 whose (bf16 in + f32 out) blocks fit the budget."""
    cl = _ru(c, 128)
    cand = m_total
    for t in sorted((d for d in range(1, m_total + 1) if m_total % d == 0), reverse=True):
        if (t % 8 != 0) and (t != m_total):
            continue
        est = 2 * t * cl * 2 + 2 * t * cl * 4 + 4 * cl * 4 + 2 * t * cl * 4
        cand = t
        if est <= budget:
            return t
    return cand


# ---------------- pass 1: conv (cell-GEMM) + per-image batch-stat partials ----------------
def _conv_bn_stats_kernel(xm_ref, xb_ref, w_ref, y_ref, st_ref,
                          slab_ref, stat_ref, *, th, wo, c4):
    # xm_ref: (1, th, Ws, 4*Cin) bf16   s2d rows of this tile
    # xb_ref: (1, 1,  Ws, 4*Cin) bf16   one boundary s2d row (for the kh=2 taps)
    # w_ref : (2, 2, 4*Cin, Cout) bf16  per-cell weight matrices
    # y_ref : (1, th*Wo, Cout)   bf16   conv output tile
    # st_ref: (1, 2, Cout)       f32    per-image [sum; sumsq] (written once per image)
    h = pl.program_id(1)

    @pl.when(h == 0)
    def _():
        stat_ref[...] = jnp.zeros_like(stat_ref)

    # Assemble the (th+1)-row s2d slab for this tile in VMEM (main rows + boundary row).
    slab_ref[0:th] = xm_ref[0]
    slab_ref[th:th + 1] = xb_ref[0]

    cout = y_ref.shape[-1]
    acc = jnp.zeros((th * wo, cout), jnp.float32)
    # 2x2 cell decomposition of the strided 3x3 conv: four K=4*Cin GEMMs, f32 accumulation.
    for dh in range(2):
        for dw in range(2):
            x = slab_ref[dh:dh + th, dw:dw + wo, :].reshape(th * wo, c4)
            acc = acc + jnp.dot(x, w_ref[dh, dw],
                                preferred_element_type=jnp.float32)

    y_ref[0] = acc.astype(y_ref.dtype)
    # Single-pass moments (note: E[y^2]-E[y]^2 in f32; fine for this layer's dynamic range).
    stat_ref[0:1, :] += jnp.sum(acc, axis=0, keepdims=True)
    stat_ref[1:2, :] += jnp.sum(acc * acc, axis=0, keepdims=True)

    @pl.when(h == pl.num_programs(1) - 1)
    def _():
        st_ref[0] = stat_ref[...]


# ---------------- pass 2: fused BN affine + LeakyReLU (fully parallel) ---------------------
def _bn_act_kernel(y_ref, scale_ref, bias_ref, o_ref, *, negative_slope):
    y = y_ref[...].astype(jnp.float32)
    z = y * scale_ref[...] + bias_ref[...]
    o_ref[...] = jnp.where(z > 0, z, negative_slope * z)


def downsampling_layer(x_nchw, weight, gamma, beta, *, eps=1e-5, negative_slope=0.1):
    """Forward of DownsamplingLayer: Conv2d(3,2,1,bias=False) -> BN (batch stats) -> LeakyReLU(0.1)."""
    N, Cin, H, W = x_nchw.shape
    Cout = weight.shape[0]
    Ho = (H - 1) // 2 + 1
    Wo = (W - 1) // 2 + 1
    Hs, Ws = Ho + 1, Wo + 1
    C4 = 4 * Cin

    # --- glue (~1x input traffic): NCHW -> bf16 NHWC -> zero-pad -> space-to-depth(2). ---
    x = jnp.transpose(x_nchw, (0, 2, 3, 1)).astype(jnp.bfloat16)
    xp = jnp.pad(x, ((0, 0), (1, 2 * Hs - H - 1), (1, 2 * Ws - W - 1), (0, 0)))
    s2d = xp.reshape(N, Hs, 2, Ws, 2, Cin)
    s2d = jnp.transpose(s2d, (0, 1, 3, 2, 4, 5)).reshape(N, Hs, Ws, C4)

    # Conv weight (Cout, Cin, 3, 3) -> per-cell (2, 2, 4*Cin, Cout) matrices; taps falling
    # outside the 3x3 window stay zero, so the cell conv reproduces the strided conv exactly.
    w_t = jnp.transpose(weight, (2, 3, 1, 0)).astype(jnp.float32)        # (3, 3, Cin, Cout)
    w6 = jnp.zeros((2, 2, 2, 2, Cin, Cout), jnp.float32)
    for kh in range(3):
        for kw in range(3):
            w6 = w6.at[kh // 2, kw // 2, kh % 2, kw % 2].set(w_t[kh, kw])
    w_cells = w6.reshape(2, 2, C4, Cout).astype(jnp.bfloat16)

    # --- VMEM budget per generation (v7x: 64 MiB -> ~48 MiB limit; v5e/v6e: up to ~96 MiB). ---
    try:
        vmem_cap = int(pltpu.get_tpu_info().vmem_capacity_bytes)
    except Exception:
        vmem_cap = 64 * 2 ** 20
    tile_budget = vmem_cap // 3
    th, est1 = _pick_tile_h(Ho, Wo, C4, Cout, tile_budget)
    n_h = Ho // th
    vmem_limit = int(min(vmem_cap * 3 // 4, max(32 * 2 ** 20, 2 * est1)))

    # ---- pass 1: tiled conv + per-image sum / sumsq ----
    y_bf16, stats = pl.pallas_call(
        functools.partial(_conv_bn_stats_kernel, th=th, wo=Wo, c4=C4),
        out_shape=(jax.ShapeDtypeStruct((N, Ho * Wo, Cout), jnp.bfloat16),
                   jax.ShapeDtypeStruct((N, 2, Cout), jnp.float32)),
        grid=(N, n_h),
        in_specs=[
            pl.BlockSpec((1, th, Ws, C4), lambda n, h: (n, h, 0, 0)),
            # same s2d array again: one boundary row at element offset h*th + th
            pl.BlockSpec((1, 1, Ws, C4), lambda n, h: (n, h * th + th, 0, 0)),
            pl.BlockSpec((2, 2, C4, Cout), lambda n, h: (0, 0, 0, 0)),
        ],
        out_specs=(
            pl.BlockSpec((1, th * Wo, Cout), lambda n, h: (n, h, 0)),
            pl.BlockSpec((1, 2, Cout), lambda n, h: (n, 0, 0)),
        ),
        scratch_shapes=[
            pltpu.VMEM((th + 1, Ws, C4), jnp.bfloat16),
            pltpu.VMEM((2, Cout), jnp.float32),
        ],
        compiler_params=pltpu.CompilerParams(
            dimension_semantics=("parallel", "arbitrary"),
            vmem_limit_bytes=vmem_limit),
    )(s2d, s2d, w_cells)

    # ---- tiny glue: combine per-image partials, fold stats + gamma/beta into scale/bias ----
    m_total = N * Ho * Wo
    stat_sum = jnp.sum(stats, axis=0)                       # (2, Cout)
    mean = stat_sum[0:1] / m_total
    var = jnp.maximum(stat_sum[1:2] / m_total - mean * mean, 0.0)   # biased variance (BN semantics)
    scale = gamma.astype(jnp.float32).reshape(1, Cout) * jax.lax.rsqrt(var + eps)
    bias = beta.astype(jnp.float32).reshape(1, Cout) - mean * scale
    scale3 = scale.reshape(1, 1, Cout)
    bias3 = bias.reshape(1, 1, Cout)

    # ---- pass 2: fully parallel normalize + affine + LeakyReLU (tiling decoupled from pass 1) ----
    tr = _pick_tile_rows(Ho * Wo, Cout, tile_budget)
    nb = (Ho * Wo) // tr
    out_f32 = pl.pallas_call(
        functools.partial(_bn_act_kernel, negative_slope=negative_slope),
        out_shape=jax.ShapeDtypeStruct((N, Ho * Wo, Cout), jnp.float32),
        grid=(N, nb),
        in_specs=[
            pl.BlockSpec((1, tr, Cout), lambda n, j: (n, j, 0)),
            pl.BlockSpec((1, 1, Cout), lambda n, j: (0, 0, 0)),
            pl.BlockSpec((1, 1, Cout), lambda n, j: (0, 0, 0)),
        ],
        out_specs=pl.BlockSpec((1, tr, Cout), lambda n, j: (n, j, 0)),
        compiler_params=pltpu.CompilerParams(
            dimension_semantics=("parallel", "parallel"),
            vmem_limit_bytes=vmem_limit),
    )(y_bf16, scale3, bias3)

    out = out_f32.reshape(N, Ho, Wo, Cout)
    return jnp.transpose(out, (0, 3, 1, 2))                 # back to NCHW


def _reference(x_nchw, weight, gamma, beta, eps=1e-5, negative_slope=0.1):
    # Pure-JAX f32 reference (NCHW conv + training-mode BN + LeakyReLU).
    y = jax.lax.conv_general_dilated(
        x_nchw.astype(jnp.float32), weight.astype(jnp.float32),
        window_strides=(2, 2), padding=((1, 1), (1, 1)),
        dimension_numbers=("NCHW", "OIHW", "NCHW"))
    mean = jnp.mean(y, axis=(0, 2, 3), keepdims=True)
    var = jnp.mean((y - mean) ** 2, axis=(0, 2, 3), keepdims=True)
    y = (y - mean) * jax.lax.rsqrt(var + eps)
    y = y * gamma.reshape(1, -1, 1, 1) + beta.reshape(1, -1, 1, 1)
    return jnp.where(y > 0, y, negative_slope * y)


if __name__ == "__main__":
    key = jax.random.PRNGKey(0)
    k1, k2, k3, k4 = jax.random.split(key, 4)
    N, Cin, H, W, Cout = 2, 4, 16, 16, 8

    x = jax.random.normal(k1, (N, Cin, H, W), jnp.float32)
    weight = 0.1 * jax.random.normal(k2, (Cout, Cin, 3, 3), jnp.float32)   # Conv2d weight
    gamma = 1.0 + 0.1 * jax.random.normal(k3, (Cout,), jnp.float32)        # BN weight
    beta = 0.1 * jax.random.normal(k4, (Cout,), jnp.float32)               # BN bias

    out = jax.block_until_ready(jax.jit(downsampling_layer)(x, weight, gamma, beta))
    ref = _reference(x, weight, gamma, beta)

    assert out.shape == (N, Cout, H // 2, W // 2), out.shape
    err = float(jnp.max(jnp.abs(out - ref)))
    # bf16 MXU operands + bf16 intermediate y (f32 accumulation/stats) vs f32 reference.
    assert err < 7e-2, err
    print("KERNEL_OK")
</pallas_src>

<mosaic_0001>
module attributes {stable_mosaic.version = 11 : i64} {
  func.func @_conv_bn_stats_kernel(%arg0: i32, %arg1: i32, %arg2: memref<1x8x9x16xbf16, #tpu.memory_space<vmem>>, %arg3: memref<1x1x9x16xbf16, #tpu.memory_space<vmem>>, %arg4: memref<2x2x16x8xbf16, #tpu.memory_space<vmem>>, %arg5: memref<1x64x8xbf16, #tpu.memory_space<vmem>>, %arg6: memref<1x2x8xf32, #tpu.memory_space<vmem>>, %arg7: memref<9x9x16xbf16, #tpu.memory_space<vmem>>, %arg8: memref<2x8xf32, #tpu.memory_space<vmem>>) attributes {dimension_semantics = [#tpu.dimension_semantics<parallel>, #tpu.dimension_semantics<arbitrary>], iteration_bounds = array<i64: 2, 1>, scalar_prefetch = 0 : i64, scratch_operands = 2 : i64, tpu.core_type = #tpu.core_type<tc>, window_params = [{transform_indices = @transform_0, window_bounds = array<i64: 1, 8, 9, 16>}, {transform_indices = @transform_1, window_bounds = array<i64: 1, 1, 9, 16>}, {pipeline_mode = #tpu.pipeline_mode<synchronous>, transform_indices = @transform_2, window_bounds = array<i64: 2, 2, 16, 8>}, {transform_indices = @transform_3, window_bounds = array<i64: 1, 64, 8>}, {transform_indices = @transform_4, window_bounds = array<i64: 1, 2, 8>}]} {
    %c0_i32 = arith.constant 0 : i32
    %0 = arith.cmpi eq, %arg1, %c0_i32 : i32
    %1 = arith.extui %0 : i1 to i32
    %c0_i32_0 = arith.constant 0 : i32
    %2 = arith.cmpi ne, %1, %c0_i32_0 : i32
    scf.if %2 {
      %cst_59 = arith.constant 0.000000e+00 : f32
      %52 = vector.broadcast %cst_59 : f32 to vector<2x8xf32>
      %c0_60 = arith.constant 0 : index
      %c0_61 = arith.constant 0 : index
      %53 = vector.load %arg8[%c0_60, %c0_61] : memref<2x8xf32, #tpu.memory_space<vmem>>, vector<2x8xf32>
      tpu.vector_store %arg8[%c0_60, %c0_61], %52 {strides = array<i32>} : memref<2x8xf32, #tpu.memory_space<vmem>>, vector<2x8xf32>,
    } else {
    }
    %c0 = arith.constant 0 : index
    %c0_1 = arith.constant 0 : index
    %c0_2 = arith.constant 0 : index
    %c0_3 = arith.constant 0 : index
    %3 = vector.load %arg2[%c0, %c0_1, %c0_2, %c0_3] : memref<1x8x9x16xbf16, #tpu.memory_space<vmem>>, vector<1x8x9x16xbf16>
    %4 = vector.shape_cast %3 : vector<1x8x9x16xbf16> to vector<8x9x16xbf16>
    %c0_4 = arith.constant 0 : index
    %c0_5 = arith.constant 0 : index
    %c0_6 = arith.constant 0 : index
    %5 = vector.load %arg7[%c0_4, %c0_5, %c0_6] : memref<9x9x16xbf16, #tpu.memory_space<vmem>>, vector<8x9x16xbf16>
    tpu.vector_store %arg7[%c0_4, %c0_5, %c0_6], %4 {strides = array<i32>} : memref<9x9x16xbf16, #tpu.memory_space<vmem>>, vector<8x9x16xbf16>,
    %c0_7 = arith.constant 0 : index
    %c0_8 = arith.constant 0 : index
    %c0_9 = arith.constant 0 : index
    %c0_10 = arith.constant 0 : index
    %6 = vector.load %arg3[%c0_7, %c0_8, %c0_9, %c0_10] : memref<1x1x9x16xbf16, #tpu.memory_space<vmem>>, vector<1x1x9x16xbf16>
    %7 = vector.shape_cast %6 : vector<1x1x9x16xbf16> to vector<1x9x16xbf16>
    %c8 = arith.constant 8 : index
    %c0_11 = arith.constant 0 : index
    %c0_12 = arith.constant 0 : index
    %8 = vector.load %arg7[%c8, %c0_11, %c0_12] : memref<9x9x16xbf16, #tpu.memory_space<vmem>>, vector<1x9x16xbf16>
    tpu.vector_store %arg7[%c8, %c0_11, %c0_12], %7 {strides = array<i32>} : memref<9x9x16xbf16, #tpu.memory_space<vmem>>, vector<1x9x16xbf16>,
    %cst = arith.constant 0.000000e+00 : f32
    %9 = vector.broadcast %cst : f32 to vector<64x8xf32>
    %c0_13 = arith.constant 0 : index
    %c0_14 = arith.constant 0 : index
    %c0_15 = arith.constant 0 : index
    %10 = vector.load %arg7[%c0_13, %c0_14, %c0_15] : memref<9x9x16xbf16, #tpu.memory_space<vmem>>, vector<8x8x16xbf16>
    %11 = vector.shape_cast %10 : vector<8x8x16xbf16> to vector<64x16xbf16>
    %c0_16 = arith.constant 0 : index
    %c0_17 = arith.constant 0 : index
    %c0_18 = arith.constant 0 : index
    %c0_19 = arith.constant 0 : index
    %12 = vector.load %arg4[%c0_16, %c0_17, %c0_18, %c0_19] : memref<2x2x16x8xbf16, #tpu.memory_space<vmem>>, vector<1x1x16x8xbf16>
    %13 = vector.shape_cast %12 : vector<1x1x16x8xbf16> to vector<16x8xbf16>
    %cst_20 = arith.constant dense<0.000000e+00> : vector<64x8xf32>
    %14 = tpu.matmul %11, %13, %cst_20 {dimension_numbers = #tpu.dot_dimension_numbers<[1], [0], [0], [1], [0, 0, 1, 1], [], []>} : vector<64x16xbf16>, vector<16x8xbf16>, vector<64x8xf32> -> vector<64x8xf32>
    %15 = arith.addf %9, %14 : vector<64x8xf32>
    %c0_21 = arith.constant 0 : index
    %c1 = arith.constant 1 : index
    %c0_22 = arith.constant 0 : index
    %16 = vector.load %arg7[%c0_21, %c1, %c0_22] : memref<9x9x16xbf16, #tpu.memory_space<vmem>>, vector<8x8x16xbf16>
    %17 = vector.shape_cast %16 : vector<8x8x16xbf16> to vector<64x16xbf16>
    %c0_23 = arith.constant 0 : index
    %c1_24 = arith.constant 1 : index
    %c0_25 = arith.constant 0 : index
    %c0_26 = arith.constant 0 : index
    %18 = vector.load %arg4[%c0_23, %c1_24, %c0_25, %c0_26] : memref<2x2x16x8xbf16, #tpu.memory_space<vmem>>, vector<1x1x16x8xbf16>
    %19 = vector.shape_cast %18 : vector<1x1x16x8xbf16> to vector<16x8xbf16>
    %cst_27 = arith.constant dense<0.000000e+00> : vector<64x8xf32>
    %20 = tpu.matmul %17, %19, %cst_27 {dimension_numbers = #tpu.dot_dimension_numbers<[1], [0], [0], [1], [0, 0, 1, 1], [], []>} : vector<64x16xbf16>, vector<16x8xbf16>, vector<64x8xf32> -> vector<64x8xf32>
    %21 = arith.addf %15, %20 : vector<64x8xf32>
    %c1_28 = arith.constant 1 : index
    %c0_29 = arith.constant 0 : index
    %c0_30 = arith.constant 0 : index
    %22 = vector.load %arg7[%c1_28, %c0_29, %c0_30] : memref<9x9x16xbf16, #tpu.memory_space<vmem>>, vector<8x8x16xbf16>
    %23 = vector.shape_cast %22 : vector<8x8x16xbf16> to vector<64x16xbf16>
    %c1_31 = arith.constant 1 : index
    %c0_32 = arith.constant 0 : index
    %c0_33 = arith.constant 0 : index
    %c0_34 = arith.constant 0 : index
    %24 = vector.load %arg4[%c1_31, %c0_32, %c0_33, %c0_34] : memref<2x2x16x8xbf16, #tpu.memory_space<vmem>>, vector<1x1x16x8xbf16>
    %25 = vector.shape_cast %24 : vector<1x1x16x8xbf16> to vector<16x8xbf16>
    %cst_35 = arith.constant dense<0.000000e+00> : vector<64x8xf32>
    %26 = tpu.matmul %23, %25, %cst_35 {dimension_numbers = #tpu.dot_dimension_numbers<[1], [0], [0], [1], [0, 0, 1, 1], [], []>} : vector<64x16xbf16>, vector<16x8xbf16>, vector<64x8xf32> -> vector<64x8xf32>
    %27 = arith.addf %21, %26 : vector<64x8xf32>
    %c1_36 = arith.constant 1 : index
    %c1_37 = arith.constant 1 : index
    %c0_38 = arith.constant 0 : index
    %28 = vector.load %arg7[%c1_36, %c1_37, %c0_38] : memref<9x9x16xbf16, #tpu.memory_space<vmem>>, vector<8x8x16xbf16>
    %29 = vector.shape_cast %28 : vector<8x8x16xbf16> to vector<64x16xbf16>
    %c1_39 = arith.constant 1 : index
    %c1_40 = arith.constant 1 : index
    %c0_41 = arith.constant 0 : index
    %c0_42 = arith.constant 0 : index
    %30 = vector.load %arg4[%c1_39, %c1_40, %c0_41, %c0_42] : memref<2x2x16x8xbf16, #tpu.memory_space<vmem>>, vector<1x1x16x8xbf16>
    %31 = vector.shape_cast %30 : vector<1x1x16x8xbf16> to vector<16x8xbf16>
    %cst_43 = arith.constant dense<0.000000e+00> : vector<64x8xf32>
    %32 = tpu.matmul %29, %31, %cst_43 {dimension_numbers = #tpu.dot_dimension_numbers<[1], [0], [0], [1], [0, 0, 1, 1], [], []>} : vector<64x16xbf16>, vector<16x8xbf16>, vector<64x8xf32> -> vector<64x8xf32>
    %33 = arith.addf %27, %32 : vector<64x8xf32>
    %34 = arith.truncf %33 : vector<64x8xf32> to vector<64x8xbf16>
    %c0_44 = arith.constant 0 : index
    %c0_45 = arith.constant 0 : index
    %c0_46 = arith.constant 0 : index
    %35 = vector.load %arg5[%c0_44, %c0_45, %c0_46] : memref<1x64x8xbf16, #tpu.memory_space<vmem>>, vector<1x64x8xbf16>
    %36 = vector.shape_cast %35 : vector<1x64x8xbf16> to vector<64x8xbf16>
    %37 = vector.shape_cast %34 : vector<64x8xbf16> to vector<1x64x8xbf16>
    tpu.vector_store %arg5[%c0_44, %c0_45, %c0_46], %37 {strides = array<i32>} : memref<1x64x8xbf16, #tpu.memory_space<vmem>>, vector<1x64x8xbf16>,
    %c0_47 = arith.constant 0 : index
    %c0_48 = arith.constant 0 : index
    %38 = vector.load %arg8[%c0_47, %c0_48] : memref<2x8xf32, #tpu.memory_space<vmem>>, vector<1x8xf32>
    %cst_49 = arith.constant dense<0.000000e+00> : vector<8xf32>
    %39 = vector.multi_reduction <add>, %33, %cst_49 [0] : vector<64x8xf32> to vector<8xf32>
    %40 = vector.shape_cast %39 : vector<8xf32> to vector<1x8xf32>
    %41 = arith.addf %38, %40 : vector<1x8xf32>
    %c0_50 = arith.constant 0 : index
    %c0_51 = arith.constant 0 : index
    %42 = vector.load %arg8[%c0_50, %c0_51] : memref<2x8xf32, #tpu.memory_space<vmem>>, vector<1x8xf32>
    tpu.vector_store %arg8[%c0_50, %c0_51], %41 {strides = array<i32>} : memref<2x8xf32, #tpu.memory_space<vmem>>, vector<1x8xf32>,
    %c1_52 = arith.constant 1 : index
    %c0_53 = arith.constant 0 : index
    %43 = vector.load %arg8[%c1_52, %c0_53] : memref<2x8xf32, #tpu.memory_space<vmem>>, vector<1x8xf32>
    %44 = arith.mulf %33, %33 : vector<64x8xf32>
    %cst_54 = arith.constant dense<0.000000e+00> : vector<8xf32>
    %45 = vector.multi_reduction <add>, %44, %cst_54 [0] : vector<64x8xf32> to vector<8xf32>
    %46 = vector.shape_cast %45 : vector<8xf32> to vector<1x8xf32>
    %47 = arith.addf %43, %46 : vector<1x8xf32>
    %c1_55 = arith.constant 1 : index
    %c0_56 = arith.constant 0 : index
    %48 = vector.load %arg8[%c1_55, %c0_56] : memref<2x8xf32, #tpu.memory_space<vmem>>, vector<1x8xf32>
    tpu.vector_store %arg8[%c1_55, %c0_56], %47 {strides = array<i32>} : memref<2x8xf32, #tpu.memory_space<vmem>>, vector<1x8xf32>,
    %c0_i32_57 = arith.constant 0 : i32
    %49 = arith.cmpi eq, %arg1, %c0_i32_57 : i32
    %50 = arith.extui %49 : i1 to i32
    %c0_i32_58 = arith.constant 0 : i32
    %51 = arith.cmpi ne, %50, %c0_i32_58 : i32
    scf.if %51 {
      %c0_59 = arith.constant 0 : index
      %c0_60 = arith.constant 0 : index
      %52 = vector.load %arg8[%c0_59, %c0_60] : memref<2x8xf32, #tpu.memory_space<vmem>>, vector<2x8xf32>
      %c0_61 = arith.constant 0 : index
      %c0_62 = arith.constant 0 : index
      %c0_63 = arith.constant 0 : index
      %53 = vector.load %arg6[%c0_61, %c0_62, %c0_63] : memref<1x2x8xf32, #tpu.memory_space<vmem>>, vector<1x2x8xf32>
      %54 = vector.shape_cast %53 : vector<1x2x8xf32> to vector<2x8xf32>
      %55 = vector.shape_cast %52 : vector<2x8xf32> to vector<1x2x8xf32>
      tpu.vector_store %arg6[%c0_61, %c0_62, %c0_63], %55 {strides = array<i32>} : memref<1x2x8xf32, #tpu.memory_space<vmem>>, vector<1x2x8xf32>,
    } else {
    }
    return
  }
  func.func @transform_0(%arg0: i32, %arg1: i32) -> (i32, i32, i32, i32) {
    %c0_i32 = arith.constant 0 : i32
    %c0_i32_0 = arith.constant 0 : i32
    %c0_i32_1 = arith.constant 0 : i32
    return %arg0, %arg1, %c0_i32, %c0_i32_0 : i32, i32, i32, i32
  }
  func.func @transform_1(%arg0: i32, %arg1: i32) -> (i32, i32, i32, i32) {
    %c8_i32 = arith.constant 8 : i32
    %0 = arith.muli %arg1, %c8_i32 : i32
    %c8_i32_0 = arith.constant 8 : i32
    %1 = arith.addi %0, %c8_i32_0 : i32
    %c0_i32 = arith.constant 0 : i32
    %c0_i32_1 = arith.constant 0 : i32
    %c0_i32_2 = arith.constant 0 : i32
    return %arg0, %1, %c0_i32, %c0_i32_1 : i32, i32, i32, i32
  }
  func.func @transform_2(%arg0: i32, %arg1: i32) -> (i32, i32, i32, i32) {
    %c0_i32 = arith.constant 0 : i32
    %c0_i32_0 = arith.constant 0 : i32
    %c0_i32_1 = arith.constant 0 : i32
    %c0_i32_2 = arith.constant 0 : i32
    %c0_i32_3 = arith.constant 0 : i32
    return %c0_i32, %c0_i32_0, %c0_i32_1, %c0_i32_2 : i32, i32, i32, i32
  }
  func.func @transform_3(%arg0: i32, %arg1: i32) -> (i32, i32, i32) {
    %c0_i32 = arith.constant 0 : i32
    %c0_i32_0 = arith.constant 0 : i32
    return %arg0, %arg1, %c0_i32 : i32, i32, i32
  }
  func.func @transform_4(%arg0: i32, %arg1: i32) -> (i32, i32, i32) {
    %c0_i32 = arith.constant 0 : i32
    %c0_i32_0 = arith.constant 0 : i32
    %c0_i32_1 = arith.constant 0 : i32
    return %arg0, %c0_i32, %c0_i32_0 : i32, i32, i32
  }
}

module attributes {stable_mosaic.version = 11 : i64} {
  func.func @_bn_act_kernel(%arg0: i32, %arg1: i32, %arg2: memref<1x64x8xbf16, #tpu.memory_space<vmem>>, %arg3: memref<1x1x8xf32, #tpu.memory_space<vmem>>, %arg4: memref<1x1x8xf32, #tpu.memory_space<vmem>>, %arg5: memref<1x64x8xf32, #tpu.memory_space<vmem>>) attributes {dimension_semantics = [#tpu.dimension_semantics<parallel>, #tpu.dimension_semantics<parallel>], iteration_bounds = array<i64: 2, 1>, scalar_prefetch = 0 : i64, scratch_operands = 0 : i64, tpu.core_type = #tpu.core_type<tc>, window_params = [{transform_indices = @transform_0, window_bounds = array<i64: 1, 64, 8>}, {pipeline_mode = #tpu.pipeline_mode<synchronous>, transform_indices = @transform_1, window_bounds = array<i64: 1, 1, 8>}, {pipeline_mode = #tpu.pipeline_mode<synchronous>, transform_indices = @transform_2, window_bounds = array<i64: 1, 1, 8>}, {transform_indices = @transform_3, window_bounds = array<i64: 1, 64, 8>}]} {
    %c0 = arith.constant 0 : index
    %c0_0 = arith.constant 0 : index
    %c0_1 = arith.constant 0 : index
    %0 = vector.load %arg2[%c0, %c0_0, %c0_1] : memref<1x64x8xbf16, #tpu.memory_space<vmem>>, vector<1x64x8xbf16>
    %1 = arith.extf %0 : vector<1x64x8xbf16> to vector<1x64x8xf32>
    %c0_2 = arith.constant 0 : index
    %c0_3 = arith.constant 0 : index
    %c0_4 = arith.constant 0 : index
    %2 = vector.load %arg3[%c0_2, %c0_3, %c0_4] : memref<1x1x8xf32, #tpu.memory_space<vmem>>, vector<1x1x8xf32>
    %3 = vector.broadcast %2 : vector<1x1x8xf32> to vector<1x64x8xf32>
    %4 = arith.mulf %1, %3 : vector<1x64x8xf32>
    %c0_5 = arith.constant 0 : index
    %c0_6 = arith.constant 0 : index
    %c0_7 = arith.constant 0 : index
    %5 = vector.load %arg4[%c0_5, %c0_6, %c0_7] : memref<1x1x8xf32, #tpu.memory_space<vmem>>, vector<1x1x8xf32>
    %6 = vector.broadcast %5 : vector<1x1x8xf32> to vector<1x64x8xf32>
    %7 = arith.addf %4, %6 : vector<1x64x8xf32>
    %cst = arith.constant 0.000000e+00 : f32
    %8 = vector.broadcast %cst : f32 to vector<1x64x8xf32>
    %9 = arith.cmpf ogt, %7, %8 : vector<1x64x8xf32>
    %cst_8 = arith.constant 1.000000e-01 : f32
    %10 = vector.broadcast %cst_8 : f32 to vector<1x64x8xf32>
    %11 = arith.mulf %10, %7 : vector<1x64x8xf32>
    %12 = arith.select %9, %7, %11 : vector<1x64x8xi1>, vector<1x64x8xf32>
    %c0_9 = arith.constant 0 : index
    %c0_10 = arith.constant 0 : index
    %c0_11 = arith.constant 0 : index
    %13 = vector.load %arg5[%c0_9, %c0_10, %c0_11] : memref<1x64x8xf32, #tpu.memory_space<vmem>>, vector<1x64x8xf32>
    tpu.vector_store %arg5[%c0_9, %c0_10, %c0_11], %12 {strides = array<i32>} : memref<1x64x8xf32, #tpu.memory_space<vmem>>, vector<1x64x8xf32>,
    return
  }
  func.func @transform_0(%arg0: i32, %arg1: i32) -> (i32, i32, i32) {
    %c0_i32 = arith.constant 0 : i32
    %c0_i32_0 = arith.constant 0 : i32
    return %arg0, %arg1, %c0_i32 : i32, i32, i32
  }
  func.func @transform_1(%arg0: i32, %arg1: i32) -> (i32, i32, i32) {
    %c0_i32 = arith.constant 0 : i32
    %c0_i32_0 = arith.constant 0 : i32
    %c0_i32_1 = arith.constant 0 : i32
    %c0_i32_2 = arith.constant 0 : i32
    return %c0_i32, %c0_i32_0, %c0_i32_1 : i32, i32, i32
  }
  func.func @transform_2(%arg0: i32, %arg1: i32) -> (i32, i32, i32) {
    %c0_i32 = arith.constant 0 : i32
    %c0_i32_0 = arith.constant 0 : i32
    %c0_i32_1 = arith.constant 0 : i32
    %c0_i32_2 = arith.constant 0 : i32
    return %c0_i32, %c0_i32_0, %c0_i32_1 : i32, i32, i32
  }
  func.func @transform_3(%arg0: i32, %arg1: i32) -> (i32, i32, i32) {
    %c0_i32 = arith.constant 0 : i32
    %c0_i32_0 = arith.constant 0 : i32
    return %arg0, %arg1, %c0_i32 : i32, i32, i32
  }
}

</mosaic_0001>

<bundles_post_ra>
// kernel: downsampling_layer.3
= control target key start
LH: loop header
LB: loop body
LE: loop exit
PB: predicated region body
PF: predicated region fallthrough
CT: control target
= control target key end

     0   :  { %s478_s12 = smov 0   ;;  %s480_s13 = smov 0   ;;  %s539_s0 = inlined_call_operand.vmem [shape: bf16[2,64,8], index: 0, kind: input, shape index: {}]   ;;  %s540_s1 = inlined_call_operand.vmem [shape: f32[1,1,8], index: 1, kind: input, shape index: {}]   ;;  %s541_s2 = inlined_call_operand.vmem [shape: f32[1,1,8], index: 2, kind: input, shape index: {}]   ;;  %s542_s3 = inlined_call_operand.vmem [shape: f32[2,64,8], index: 3, kind: output, shape index: {}]  }
   0x1   :  { %s482_s14 = smov 0  }
   0x2 LB: > { %s25_s15 = sadd.s32 1, %s452_s13  ;;  %p380_p0 = scmp.ge.s32.totalorder %s456_s14, 1  ;;  %s456_s14 = sphi %s482_s14, %s13_s14   ;;  %s452_s13 = sphi %s480_s13, %s544_s13   ;;  %s448_s12 = sphi %s478_s12, %s543_s12  }
   0x3   : > { %p27_p1 = scmp.ge.s32.totalorder %s25_s15, 2  ;;  %p158_p2 = scmp.lt.s32.totalorder %s456_s14, 3 }
   0x5   : > { %s546_s15 = smov (%p27_p1, %s25_s15), 0  ;;  %p159_p3 = pnand %p380_p0, %p158_p2 }
   0x6   : > { %p191_p4 = scmp.lt.s32.totalorder (!%p159_p3), %s448_s12, 1 }
   0x7   : > { %162 = sbr.rel (%p159_p3) target bundleno = 31 (0x1f), region = 32 }
   0xc   : > { %s548_s12 = smov (!%p191_p4, %s448_s12), 1  ;;  %v385_v0 = vld [vmem:[%s540_s1] ss:$0 sm:$0xff]  ;;  %vm280_vm0 = vcmask 64512  }
   0xd   : > { %s389_s16 = sshll.u32 %s548_s12, 5  ;;  %v386_v9 = vld [vmem:[%s541_s2] ss:$0 sm:$0xff]  ;;  %s390_s24 = sshll.u32 %s548_s12, 6 }
   0xe   : > { %s198_s19 = scalar_lea.vmem %s539_s0, %s389_s16  ;;  %s512_s27 = scalar_lea.vmem %s542_s3, %s390_s24 }
   0xf   : > { %v392_v1 = vld [vmem:[%s198_s19] sm:$0xff]   ;;  %v407_v2 = vld [vmem:[%s198_s19 + $0x8] sm:$0xff]   ;;  %v408_v3 = vld [vmem:[%s198_s19 + $0x10] sm:$0xff]  }
  0x10   : > { %v393_v4 = vunpack.c.l.bf16 %v392_v1  ;;  %v394_v5 = vunpack.c.h.bf16 %v392_v1  ;;  %v397_v6 = vunpack.c.l.bf16 %v407_v2  ;;  %v398_v7 = vunpack.c.h.bf16 %v407_v2  ;;  %v409_v8 = vld [vmem:[%s198_s19 + $0x18] sm:$0xff]  }
  0x11   : > { %v401_v10 = vunpack.c.l.bf16 %v408_v3  ;;  %v402_v11 = vunpack.c.h.bf16 %v408_v3  ;;  %v405_v12 = vunpack.c.l.bf16 %v409_v8  ;;  %v406_v13 = vunpack.c.h.bf16 %v409_v8 }
  0x12   : > { %v233_v14 = vmul.f32 %v393_v4, %v385_v0  ;;  %v234_v15 = vmul.f32 %v394_v5, %v385_v0  ;;  %v235_v16 = vmul.f32 %v397_v6, %v385_v0  ;;  %v236_v17 = vmul.f32 %v398_v7, %v385_v0 }
  0x13   : > { %v237_v18 = vmul.f32 %v401_v10, %v385_v0  ;;  %v238_v19 = vmul.f32 %v402_v11, %v385_v0  ;;  %v239_v20 = vmul.f32 %v405_v12, %v385_v0  ;;  %v240_v21 = vmul.f32 %v406_v13, %v385_v0 }
  0x14   : > { %v248_v22 = vadd.f32 %v386_v9, %v233_v14  ;;  %v249_v23 = vadd.f32 %v386_v9, %v234_v15  ;;  %v250_v24 = vadd.f32 %v386_v9, %v235_v16  ;;  %v251_v25 = vadd.f32 %v386_v9, %v236_v17 }
  0x15   : > { %v252_v26 = vadd.f32 %v386_v9, %v237_v18  ;;  %v253_v27 = vadd.f32 %v386_v9, %v238_v19  ;;  %v254_v28 = vadd.f32 %v386_v9, %v239_v20  ;;  %v255_v29 = vadd.f32 %v386_v9, %v240_v21 }
  0x16   : > { %vm256_vm1 = vcmp.gt.f32.partialorder %v248_v22, 0.0  ;;  %v264_v30 = vmul.f32 0.1, %v248_v22  ;;  %vm257_vm2 = vcmp.gt.f32.partialorder %v249_v23, 0.0  ;;  %v265_v31 = vmul.f32 0.1, %v249_v23 }
  0x17   : > { %vm258_vm3 = vcmp.gt.f32.partialorder %v250_v24, 0.0  ;;  %v266_v32 = vmul.f32 0.1, %v250_v24  ;;  %vm259_vm4 = vcmp.gt.f32.partialorder %v251_v25, 0.0  ;;  %v267_v33 = vmul.f32 0.1, %v251_v25 }
  0x18   : > { %v272_v34 = vsel %vm256_vm1, %v248_v22, %v264_v30  ;;  %v273_v35 = vsel %vm257_vm2, %v249_v23, %v265_v31  ;;  %vm260_vm5 = vcmp.gt.f32.partialorder %v252_v26, 0.0  ;;  %v268_v36 = vmul.f32 0.1, %v252_v26 }
  0x19   : > { %281 = vst.msk [vmem:[%s512_s27] sm:$0xff] %vm280_vm0, %v272_v34  ;;  %282 = vst.msk [vmem:[%s512_s27 + $0x8] sm:$0xff] %vm280_vm0, %v273_v35  ;;  %v274_v37 = vsel %vm258_vm3, %v250_v24, %v266_v32  ;;  %v275_v38 = vsel %vm259_vm4, %v251_v25, %v267_v33  ;;  %vm261_vm6 = vcmp.gt.f32.partialorder %v253_v27, 0.0  ;;  %v269_v39 = vmul.f32 0.1, %v253_v27 }
  0x1a   : > { %283 = vst.msk [vmem:[%s512_s27 + $0x10] sm:$0xff] %vm280_vm0, %v274_v37  ;;  %284 = vst.msk [vmem:[%s512_s27 + $0x18] sm:$0xff] %vm280_vm0, %v275_v38  ;;  %v276_v40 = vsel %vm260_vm5, %v252_v26, %v268_v36  ;;  %vm262_vm7 = vcmp.gt.f32.partialorder %v254_v28, 0.0  ;;  %v270_v41 = vmul.f32 0.1, %v254_v28  ;;  %vm263_vm8 = vcmp.gt.f32.partialorder %v255_v29, 0.0 }
  0x1b   : > { %285 = vst.msk [vmem:[%s512_s27 + $0x20] sm:$0xff] %vm280_vm0, %v276_v40  ;;  %v277_v42 = vsel %vm261_vm6, %v253_v27, %v269_v39  ;;  %v271_v43 = vmul.f32 0.1, %v255_v29 }
  0x1c   : > { %286 = vst.msk [vmem:[%s512_s27 + $0x28] sm:$0xff] %vm280_vm0, %v277_v42  ;;  %v278_v44 = vsel %vm262_vm7, %v254_v28, %v270_v41 }
  0x1d   : > { %287 = vst.msk [vmem:[%s512_s27 + $0x30] sm:$0xff] %vm280_vm0, %v278_v44  ;;  %v279_v45 = vsel %vm263_vm8, %v255_v29, %v271_v43 }
  0x1e   : > { %288 = vst.msk [vmem:[%s512_s27 + $0x38] sm:$0xff] %vm280_vm0, %v279_v45 }
  0x1f PF: > { %s13_s14 = sadd.s32 1, %s456_s14   ;;  %s543_s12 = smov %s452_s13 }
  0x20   : > { %p10_p5 = scmp.ge.s32.totalorder %s13_s14, 4   ;;  %s544_s13 = smov %s546_s15 }
  0x22   :  { %12 = sbr.rel (!%p10_p5) target bundleno = 2 (0x2), region = 62 }

// kernel: downsampling_layer.2
= control target key start
LH: loop header
LB: loop body
LE: loop exit
PB: predicated region body
PF: predicated region fallthrough
CT: control target
= control target key end

     0   :  { %s1552_s15 = smov 0   ;;  %s1554_s16 = smov 0   ;;  %s1759_s0 = inlined_call_operand.vmem [shape: bf16[2,9,9,16], index: 0, kind: input, shape index: {}, may-alias: {0,1}]   ;;  %s1760_s1 = inlined_call_operand.vmem [shape: bf16[2,9,9,16], index: 1, kind: input, shape index: {}, may-alias: {0,1}]   ;;  %s1761_s2 = inlined_call_operand.vmem [shape: bf16[2,2,16,8], index: 2, kind: input, shape index: {}]   ;;  %s1762_s3 = inlined_call_operand.vmem [shape: bf16[2,64,8], index: 3, kind: output, shape index: {0}]   ;;  %s1763_s4 = inlined_call_operand.vmem [shape: f32[2,2,8], index: 4, kind: output, shape index: {1}]  }
   0x1   :  { %s1556_s17 = smov 0  }
   0x2 LB: > { %s27_s18 = sadd.s32 1, %s1520_s16  ;;  %p1333_p0 = scmp.ge.s32.totalorder %s1524_s17, 1  ;;  %s1524_s17 = sphi %s1556_s17, %s15_s17   ;;  %s1520_s16 = sphi %s1554_s16, %s1769_s16   ;;  %s1516_s15 = sphi %s1552_s15, %s1768_s15  }
   0x3   : > { %p29_p1 = scmp.ge.s32.totalorder %s27_s18, 2  ;;  %p221_p2 = scmp.lt.s32.totalorder %s1524_s17, 3 }
   0x5   : > { %s1771_s18 = smov (%p29_p1, %s27_s18), 0  ;;  %p222_p3 = pnand %p1333_p0, %p221_p2 }
   0x6   : > { %p282_p4 = scmp.lt.s32.totalorder (!%p222_p3), %s1516_s15, 1 }
   0x7   : > { %225 = sbr.rel (%p222_p3) target bundleno = 309 (0x135), region = 32 }
   0xc   : > { %v1490_v0 = vld [vmem:[%s1761_s2] sm:$0xff]   ;;  %v1491_v1 = vld [vmem:[%s1761_s2 + $0x8] sm:$0xff]   ;;  %s1773_s15 = smov (!%p282_p4, %s1516_s15), 1  ;;  %vm349_vm0 = vcmask 122880   ;;  %vm350_vm1 = vsmask.f32 256 }
   0xd   : > { %1432 = vmatprep.subr.bf16.mxu1 %v1490_v0  ;;  %v1581_v2 = vld [vmem:[%s1761_s2 + $0x10] sm:$0xff]   ;;  %1422 = vmatprep.subr.bf16.mxu0 %v1491_v1  ;;  %s1462_s25 = smul.u32 72, %s1773_s15  ;;  %v352_v3 = vld [vmem:[#allocation2 + $0x4] sm:$0x1]  ;;  %v356_v4 = vld [vmem:[#allocation2 + $0xc] sm:$0x1] }
   0xe   : > { %1433 = vmatpush3.bf16.msra.mxu1 %v1490_v0  ;;  %1423 = vmatpush3.bf16.msra.mxu0 %v1491_v1  ;;  %v1587_v5 = vld [vmem:[%s1761_s2 + $0x18] sm:$0xff]   ;;  %vm347_vm2 = vcmask 125952   ;;  %vm1589_vm3 = vmand %vm349_vm0, %vm350_vm1  ;;  %v360_v7 = vld [vmem:[#allocation2 + $0x14] sm:$0x1]  ;;  %vm544_vm4 = vcmask 130048   ;;  %vm329_vm8 = vcmask 58368  }
   0xf   : > { %1442 = vmatprep.subr.bf16.mxu0 %v1581_v2  ;;  %s1599_s30 = scalar_lea.vmem %s1759_s0, %s1462_s25  ;;  %v364_v8 = vld [vmem:[#allocation2 + $0x1c] sm:$0x1]  ;;  %1452 = vmatprep.subr.bf16.mxu1 %v1587_v5  ;;  %v368_v27 = vld [vmem:[#allocation2 + $0x24] sm:$0x1]  ;;  %v372_v29 = vld [vmem:[#allocation2 + $0x2c] sm:$0x1] }
  0x10   : > { %v331_v9 = vld [vmem:[%s1599_s30] sm:$0xf]  ;;  %v333_v10 = vld [vmem:[%s1599_s30 + $0x8] sm:$0xf]  ;;  %v335_v11 = vld [vmem:[%s1599_s30 + $0x10] sm:$0xf] }
  0x11   : > { %348 = vst.msk [vmem:[#allocation2] sm:$0xf] %vm347_vm2, %v331_v9  ;;  %355 = vst.msk [vmem:[#allocation2 + $0x8] sm:$0xf] %vm347_vm2, %v333_v10  ;;  %v337_v12 = vld [vmem:[%s1599_s30 + $0x18] sm:$0xf] }
  0x12   : > { %359 = vst.msk [vmem:[#allocation2 + $0x10] sm:$0xf] %vm347_vm2, %v335_v11  ;;  %v332_v13 = vld [vmem:[%s1599_s30 + $0x4] sm:$0x1]  ;;  %v334_v14 = vld [vmem:[%s1599_s30 + $0xc] sm:$0x1] }
  0x13   : > { %363 = vst.msk [vmem:[#allocation2 + $0x18] sm:$0xf] %vm347_vm2, %v337_v12  ;;  %v353_v15 = vsel %vm1589_vm3, %v332_v13, %v352_v3  ;;  %v357_v16 = vsel %vm1589_vm3, %v334_v14, %v356_v4  ;;  %v336_v17 = vld [vmem:[%s1599_s30 + $0x14] sm:$0x1]  ;;  %v338_v18 = vld [vmem:[%s1599_s30 + $0x1c] sm:$0x1] }
  0x14   : > { %v339_v19 = vld [vmem:[%s1599_s30 + $0x20] sm:$0xf]  ;;  %354 = vst [vmem:[#allocation2 + $0x4] sm:$0x1] %v353_v15  ;;  %358 = vst [vmem:[#allocation2 + $0xc] sm:$0x1] %v357_v16  ;;  %v361_v20 = vsel %vm1589_vm3, %v336_v17, %v360_v7  ;;  %v365_v21 = vsel %vm1589_vm3, %v338_v18, %v364_v8 }
  0x15   : > { %v341_v22 = vld [vmem:[%s1599_s30 + $0x28] sm:$0xf]  ;;  %367 = vst.msk [vmem:[#allocation2 + $0x20] sm:$0xf] %vm347_vm2, %v339_v19  ;;  %v343_v23 = vld [vmem:[%s1599_s30 + $0x30] sm:$0xf] }
  0x16   : > { %v345_v24 = vld [vmem:[%s1599_s30 + $0x38] sm:$0xf]  ;;  %362 = vst [vmem:[#allocation2 + $0x14] sm:$0x1] %v361_v20  ;;  %366 = vst [vmem:[#allocation2 + $0x1c] sm:$0x1] %v365_v21 }
  0x17   : > { %371 = vst.msk [vmem:[#allocation2 + $0x28] sm:$0xf] %vm347_vm2, %v341_v22  ;;  %375 = vst.msk [vmem:[#allocation2 + $0x30] sm:$0xf] %vm347_vm2, %v343_v23  ;;  %v340_v25 = vld [vmem:[%s1599_s30 + $0x24] sm:$0x1] }
  0x18   : > { %379 = vst.msk [vmem:[#allocation2 + $0x38] sm:$0xf] %vm347_vm2, %v345_v24  ;;  %v342_v26 = vld [vmem:[%s1599_s30 + $0x2c] sm:$0x1]  ;;  %v369_v28 = vsel %vm1589_vm3, %v340_v25, %v368_v27  ;;  %v344_v30 = vld [vmem:[%s1599_s30 + $0x34] sm:$0x1] }
  0x19   : > { %v346_v31 = vld [vmem:[%s1599_s30 + $0x3c] sm:$0x1]  ;;  %370 = vst [vmem:[#allocation2 + $0x24] sm:$0x1] %v369_v28  ;;  %v373_v32 = vsel %vm1589_vm3, %v342_v26, %v372_v29  ;;  %v376_v33 = vld [vmem:[#allocation2 + $0x34] sm:$0x1] }
  0x1a   : > { %v380_v34 = vld [vmem:[#allocation2 + $0x3c] sm:$0x1]  ;;  %vm408_vm5 = vsmask.f32 3328  ;;  %vm409_vm6 = vsmask.f32 7440  ;;  %v377_v35 = vsel %vm1589_vm3, %v344_v30, %v376_v33 }
  0x1b   : > { %374 = vst [vmem:[#allocation2 + $0x2c] sm:$0x1] %v373_v32  ;;  %v381_v36 = vsel %vm1589_vm3, %v346_v31, %v380_v34  ;;  %v390_v37 = vld [vmem:[#allocation2] sm:$0xf]  ;;  %v391_v38 = vld [vmem:[#allocation2 + $0x8] sm:$0xf]  ;;  %vm1645_vm7 = vmor %vm408_vm5, %vm409_vm6 }
  0x1c   : > { %v392_v39 = vld [vmem:[#allocation2 + $0x10] sm:$0xf]  ;;  %378 = vst [vmem:[#allocation2 + $0x34] sm:$0x1] %v377_v35  ;;  %382 = vst [vmem:[#allocation2 + $0x3c] sm:$0x1] %v381_v36  ;;  %v1350_v45 = vcombine.low %v390_v37, %v391_v38 }
  0x1d   : > { %v412_v40 = vshrl.u32 %v390_v37, 16  ;;  %v415_v41 = vshll.u32 %v390_v37, 16  ;;  %v426_v42 = vshrl.u32 %v391_v38, 16  ;;  %v429_v43 = vshll.u32 %v391_v38, 16  ;;  %v393_v44 = vld [vmem:[#allocation2 + $0x18] sm:$0xf] }
  0x1e   : > { %v440_v46 = vshrl.u32 %v392_v39, 16  ;;  %v443_v47 = vshll.u32 %v392_v39, 16  ;;  %v454_v48 = vshrl.u32 %v393_v44, 16  ;;  %v400_v49 = vld [vmem:[#allocation2 + $0x4] sm:$0x1]  ;;  %1434 = vmatprep.mubr.msk.bf16.mxu1 %vm544_vm4, %v1350_v45  ;;  %v457_v58 = vshll.u32 %v393_v44, 16 }
  0x1f   : > { %v414_v50 = vrot.slane %v412_v40, 4  ;;  %v417_v51 = vrot.slane %v415_v41, 5  ;;  %v428_v52 = vrot.slane %v426_v42, 4  ;;  %v431_v53 = vrot.slane %v429_v43, 5  ;;  %v401_v54 = vld [vmem:[#allocation2 + $0xc] sm:$0x1] }
  0x20   : > { %v442_v55 = vrot.slane %v440_v46, 4  ;;  %v445_v56 = vrot.slane %v443_v47, 5  ;;  %v456_v57 = vrot.slane %v454_v48, 4  ;;  %v402_v59 = vld [vmem:[#allocation2 + $0x14] sm:$0x1]  ;;  %v1351_v60 = vcombine.low %v392_v39, %v393_v44  ;;  %s1392_s5 = sadd.s32 64, %s1462_s25 }
  0x21   : > { %v418_v61 = vor.u32 %v417_v51, %v414_v50  ;;  %v421_v62 = vshll.u32 %v400_v49, 16  ;;  %v432_v63 = vor.u32 %v431_v53, %v428_v52  ;;  %v403_v0 = vld [vmem:[#allocation2 + $0x1c] sm:$0x1]  ;;  %v459_v1 = vrot.slane %v457_v58, 5  ;;  %v394_v9 = vld [vmem:[#allocation2 + $0x20] sm:$0xf]  ;;  %s307_s8 = scalar_lea.vmem %s1760_s1, %s1392_s5 }
  0x22   : > { %v435_v4 = vshll.u32 %v401_v54, 16  ;;  %v446_v7 = vor.u32 %v445_v56, %v442_v55  ;;  %v449_v8 = vshll.u32 %v402_v59, 16  ;;  %1435 = vmatmul.mubr.msk.bf16.vlgmr.msra.gmra.mxu1 %vm544_vm4, %v1351_v60  ;;  %v463_v13 = vshll.u32 %v403_v0, 16  ;;  %v395_v14 = vld [vmem:[#allocation2 + $0x28] sm:$0xf]  ;;  %s1393_s9 = sshll.u32 %s1773_s15, 5 }
  0x23   : > { %v419_v10 = vrot.slane %v418_v61, 4  ;;  %v423_v11 = vrot.slane %v421_v62, 5  ;;  %v433_v12 = vrot.slane %v432_v63, 4  ;;  %v460_v18 = vor.u32 %v459_v1, %v456_v57  ;;  %1453 = vmatpush3.bf16.msra.mxu1 %v1587_v5  ;;  %v396_v23 = vld [vmem:[#allocation2 + $0x30] sm:$0xf]  ;;  %s1711_s12 = scalar_lea.vmem %s1762_s3, %s1393_s9  ;;  %s1338_s13 = sshll.u32 %s1773_s15, 1 }
  0x24   : > { %v437_v15 = vrot.slane %v435_v4, 5  ;;  %v447_v16 = vrot.slane %v446_v7, 4  ;;  %v451_v17 = vrot.slane %v449_v8, 5  ;;  %v465_v20 = vrot.slane %v463_v13, 5  ;;  %v397_v28 = vld [vmem:[#allocation2 + $0x38] sm:$0xf]  ;;  %s323_s20 = scalar_lea.vmem %s1763_s4, %s1338_s13 }
  0x25   : > { %v424_v19 = vsel %vm1645_vm7, %v419_v10, %v423_v11  ;;  %v468_v21 = vshrl.u32 %v394_v9, 16  ;;  %v471_v22 = vshll.u32 %v394_v9, 16  ;;  %v461_v26 = vrot.slane %v460_v18, 4  ;;  %v404_v36 = vld [vmem:[#allocation2 + $0x24] sm:$0x1] }
  0x26   : > { %v438_v24 = vsel %vm1645_vm7, %v433_v12, %v437_v15  ;;  %v452_v25 = vsel %vm1645_vm7, %v447_v16, %v451_v17  ;;  %v482_v27 = vshrl.u32 %v395_v14, 16  ;;  %v485_v5 = vshll.u32 %v395_v14, 16  ;;  %v405_v37 = vld [vmem:[#allocation2 + $0x2c] sm:$0x1]  ;;  %v406_v42 = vld [vmem:[#allocation2 + $0x34] sm:$0x1] }
  0x27   : > { %v1341_v29 = vcombine.low %v424_v19, %v438_v24  ;;  %v470_v30 = vrot.slane %v468_v21, 4  ;;  %v473_v31 = vrot.slane %v471_v22, 5  ;;  %v466_v32 = vsel %vm1645_vm7, %v461_v26, %v465_v20  ;;  %v407_v47 = vld [vmem:[#allocation2 + $0x3c] sm:$0x1]  ;;  %v848_v48 = vld [vmem:[#allocation2 + $0x8] sm:$0xf] }
  0x28   : > { %v484_v33 = vrot.slane %v482_v27, 4  ;;  %v1352_v34 = vcombine.low %v394_v9, %v395_v14  ;;  %v496_v35 = vshrl.u32 %v396_v23, 16  ;;  %v1342_v38 = vcombine.low %v452_v25, %v466_v32  ;;  %v849_v53 = vld [vmem:[#allocation2 + $0xc] sm:$0x1]  ;;  %v850_v58 = vld [vmem:[#allocation2 + $0x10] sm:$0xf] }
  0x29   : > { %1424 = vmatprep.mubr.msk.bf16.mxu0 %vm544_vm4, %v1341_v29  ;;  %v487_v39 = vrot.slane %v485_v5, 5  ;;  %v499_v40 = vshll.u32 %v396_v23, 16  ;;  %v510_v41 = vshrl.u32 %v397_v28, 16  ;;  %v513_v44 = vshll.u32 %v397_v28, 16  ;;  %v851_v63 = vld [vmem:[#allocation2 + $0x14] sm:$0x1] }
  0x2a   : > { %1438 = vmatprep.mubr.msk.bf16.mxu1 %vm544_vm4, %v1352_v34  ;;  %v498_v43 = vrot.slane %v496_v35, 4  ;;  %v1353_v45 = vcombine.low %v396_v23, %v397_v28  ;;  %v474_v46 = vor.u32 %v473_v31, %v470_v30  ;;  %1425 = vmatmul.mubr.msk.bf16.vlgmr.msra.gmra.mxu0 %vm544_vm4, %v1342_v38  ;;  %v477_v51 = vshll.u32 %v404_v36, 16  ;;  %v852_v8 = vld [vmem:[#allocation2 + $0x18] sm:$0xf]  ;;  %v853_v12 = vld [vmem:[#allocation2 + $0x1c] sm:$0x1] }
  0x2b   : > { %v501_v49 = vrot.slane %v499_v40, 5  ;;  %v512_v50 = vrot.slane %v510_v41, 4  ;;  %v488_v52 = vor.u32 %v487_v39, %v484_v33  ;;  %1443 = vmatpush3.bf16.msra.mxu0 %v1581_v2  ;;  %v515_v54 = vrot.slane %v513_v44, 5  ;;  %v854_v17 = vld [vmem:[#allocation2 + $0x20] sm:$0xf] }
  0x2c   : > { %1439 = vmatmul.mubr.msk.bf16.gmra.mxu1 %vm544_vm4, %v1353_v45  ;;  %v475_v55 = vrot.slane %v474_v46, 4  ;;  %v491_v56 = vshll.u32 %v405_v37, 16  ;;  %v505_v57 = vshll.u32 %v406_v42, 16  ;;  %v479_v59 = vrot.slane %v477_v51, 5  ;;  %v1498_v26 = vld [vmem:[#allocation2 + $0x8] ss:$8 sps:$4 sm:$0xff]  }
  0x2d   : > { %v489_v60 = vrot.slane %v488_v52, 4  ;;  %v502_v61 = vor.u32 %v501_v49, %v498_v43  ;;  %v519_v62 = vshll.u32 %v407_v47, 16  ;;  %v516_v4 = vor.u32 %v515_v54, %v512_v50  ;;  %v855_v30 = vld [vmem:[#allocation2 + $0x24] sm:$0x1]  ;;  %v856_v5 = vld [vmem:[#allocation2 + $0x28] sm:$0xf] }
  0x2e   : > { %v493_v0 = vrot.slane %v491_v56, 5  ;;  %v507_v1 = vrot.slane %v505_v57, 5  ;;  %v865_v7 = vshrl.u32 %v848_v48, 16  ;;  %v480_v2 = vsel %vm1645_vm7, %v475_v55, %v479_v59  ;;  %v857_v36 = vld [vmem:[#allocation2 + $0x2c] sm:$0x1] }
  0x2f   : > { %v503_v9 = vrot.slane %v502_v61, 4  ;;  %v521_v10 = vrot.slane %v519_v62, 5  ;;  %v868_v11 = vshll.u32 %v848_v48, 16  ;;  %v517_v14 = vrot.slane %v516_v4, 4  ;;  %v858_v41 = vld [vmem:[#allocation2 + $0x30] sm:$0xf] }
  0x30   : > { %v494_v13 = vsel %vm1645_vm7, %v489_v60, %v493_v0  ;;  %v867_v15 = vrot.slane %v865_v7, 4  ;;  %v874_v16 = vshll.u32 %v849_v53, 16  ;;  %v879_v21 = vshrl.u32 %v850_v58, 16  ;;  %v383_v46 = vld [vmem:[%s307_s8] sm:$0xf] }
  0x31   : > { %v1343_v18 = vcombine.low %v480_v2, %v494_v13  ;;  %v508_v19 = vsel %vm1645_vm7, %v503_v9, %v507_v1  ;;  %v870_v20 = vrot.slane %v868_v11, 5  ;;  %v522_v22 = vsel %vm1645_vm7, %v517_v14, %v521_v10  ;;  %v1499_v50 = vld [vmem:[#allocation2 + $0x18] ss:$8 sps:$4 sm:$0xff]   ;;  %v859_v51 = vld [vmem:[#allocation2 + $0x34] sm:$0x1] }
  0x32   : > { %v876_v23 = vrot.slane %v874_v16, 5  ;;  %v882_v24 = vshll.u32 %v850_v58, 16  ;;  %v888_v25 = vshll.u32 %v851_v63, 16  ;;  %v1344_v27 = vcombine.low %v508_v19, %v522_v22  ;;  %386 = vst.msk [vmem:[#allocation2 + $0x40] sm:$0xf] %vm347_vm2, %v383_v46 }
  0x33   : > { %1428 = vmatprep.mubr.msk.bf16.mxu0 %vm544_vm4, %v1343_v18  ;;  %v871_v28 = vor.u32 %v870_v20, %v867_v15  ;;  %v881_v29 = vrot.slane %v879_v21, 4  ;;  %v893_v31 = vshrl.u32 %v852_v8, 16  ;;  %v896_v34 = vshll.u32 %v852_v8, 16  ;;  %v384_v57 = vld [vmem:[%s307_s8 + $0x4] sm:$0x1] }
  0x34   : > { %v884_v32 = vrot.slane %v882_v24, 5  ;;  %v890_v33 = vrot.slane %v888_v25, 5  ;;  %v902_v35 = vshll.u32 %v853_v12, 16  ;;  %1429 = vmatmul.mubr.msk.bf16.gmra.mxu0 %vm544_vm4, %v1344_v27  ;;  %v907_v39 = vshrl.u32 %v854_v17, 16  ;;  %v387_v58 = vld [vmem:[#allocation2 + $0x44] sm:$0x1] }
  0x35   : > { %v872_v37 = vrot.slane %v871_v28, 4  ;;  %v895_v38 = vrot.slane %v893_v31, 4  ;;  %v910_v40 = vshll.u32 %v854_v17, 16  ;;  %v898_v43 = vrot.slane %v896_v34, 5  ;;  %1444 = vmatprep.mubr.msk.bf16.mxu0 %vm544_vm4, %v1498_v26  ;;  %v860_v63 = vld [vmem:[#allocation2 + $0x38] sm:$0xf] }
  0x36   : > { %v885_v42 = vor.u32 %v884_v32, %v881_v29  ;;  %v904_v44 = vrot.slane %v902_v35, 5  ;;  %v916_v45 = vshll.u32 %v855_v30, 16  ;;  %v909_v48 = vrot.slane %v907_v39, 4  ;;  %v1500_v15 = vld [vmem:[#allocation2 + $0x28] ss:$8 sps:$4 sm:$0xff]  }
  0x37   : > { %v877_v47 = vsel %vm1645_vm7, %v872_v37, %v876_v23  ;;  %v912_v49 = vrot.slane %v910_v40, 5  ;;  %v921_v52 = vshrl.u32 %v856_v5, 16  ;;  %v899_v54 = vor.u32 %v898_v43, %v895_v38  ;;  %v861_v18 = vld [vmem:[#allocation2 + $0x3c] sm:$0x1] }
  0x38   : > { %v886_v53 = vrot.slane %v885_v42, 4  ;;  %v918_v55 = vrot.slane %v916_v45, 5  ;;  %v924_v56 = vshll.u32 %v856_v5, 16  ;;  %v930_v61 = vshll.u32 %v857_v36, 16 }
  0x39   : > { %v913_v59 = vor.u32 %v912_v49, %v909_v48  ;;  %v923_v60 = vrot.slane %v921_v52, 4  ;;  %v935_v62 = vshrl.u32 %v858_v41, 16  ;;  %v900_v1 = vrot.slane %v899_v54, 4  ;;  %v862_v25 = vld [vmem:[#allocation2 + $0x40] sm:$0xf] }
  0x3a   : > { %v891_v0 = vsel %vm1645_vm7, %v886_v53, %v890_v33  ;;  %v926_v4 = vrot.slane %v924_v56, 5  ;;  %v938_v7 = vshll.u32 %v858_v41, 16  ;;  %v932_v9 = vrot.slane %v930_v61, 5  ;;  %v1501_v33 = vld [vmem:[#allocation2 + $0x38] ss:$8 sps:$4 sm:$0xff]  }
  0x3b   : > { %v1372_v8 = vcombine.low %v877_v47, %v891_v0  ;;  %v914_v2 = vrot.slane %v913_v59, 4  ;;  %v937_v10 = vrot.slane %v935_v62, 4  ;;  %v905_v11 = vsel %vm1645_vm7, %v900_v1, %v904_v44 }
  0x3c   : > { %v927_v12 = vor.u32 %v926_v4, %v923_v60  ;;  %v940_v13 = vrot.slane %v938_v7, 5  ;;  %v944_v14 = vshll.u32 %v859_v51, 16  ;;  %1445 = vmatmul.mubr.msk.bf16.vlgmr.msra.gmra.mxu0 %vm544_vm4, %v1499_v50  ;;  %v388_v17 = vsel %vm1589_vm3, %v384_v57, %v387_v58 }
  0x3d   : > { %1454 = vmatprep.mubr.msk.bf16.mxu1 %vm544_vm4, %v1372_v8  ;;  %v919_v16 = vsel %vm1645_vm7, %v914_v2, %v918_v55  ;;  %v949_v19 = vshrl.u32 %v860_v63, 16  ;;  %v952_v20 = vshll.u32 %v860_v63, 16  ;;  %389 = vst [vmem:[#allocation2 + $0x44] sm:$0x1] %v388_v17  ;;  %1448 = vmatprep.mubr.msk.bf16.mxu0 %vm544_vm4, %v1500_v15  ;;  %v963_v28 = vshrl.u32 %v862_v25, 16 }
  0x3e   : > { %v1373_v21 = vcombine.low %v905_v11, %v919_v16  ;;  %v928_v22 = vrot.slane %v927_v12, 4  ;;  %v941_v23 = vor.u32 %v940_v13, %v937_v10  ;;  %v946_v24 = vrot.slane %v944_v14, 5 }
  0x3f   : > { %v951_v26 = vrot.slane %v949_v19, 4  ;;  %v954_v27 = vrot.slane %v952_v20, 5  ;;  %v958_v30 = vshll.u32 %v861_v18, 16  ;;  %v966_v31 = vshll.u32 %v862_v25, 16 }
  0x40   : > { %1455 = vmatmul.mubr.msk.bf16.vlgmr.msra.gmra.mxu1 %vm544_vm4, %v1373_v21  ;;  %v933_v6 = vsel %vm1645_vm7, %v928_v22, %v932_v9  ;;  %v942_v29 = vrot.slane %v941_v23, 4  ;;  %v965_v32 = vrot.slane %v963_v28, 4  ;;  %v1526_v47 = vmov 0.0  }
  0x41   : > { %v955_v5 = vor.u32 %v954_v27, %v951_v26  ;;  %v968_v35 = vrot.slane %v966_v31, 5  ;;  %v960_v38 = vrot.slane %v958_v30, 5  ;;  %330 = vst.msk [vmem:[#allocation3] sm:$0x3] %vm329_vm8, %v1526_v47  ;;  %vm1114_vm9 = vcmask 60416  }
  0x42   : > { %v947_v34 = vsel %vm1645_vm7, %v942_v29, %v946_v24  ;;  %vm1124_vm10 = vcmask 64512   ;;  %vm1147_vm11 = vcmask 57344  }
  0x43   : > { %v1374_v36 = vcombine.low %v933_v6, %v947_v34  ;;  %v956_v37 = vrot.slane %v955_v5, 4  ;;  %v969_v39 = vor.u32 %v968_v35, %v965_v32 }
  0x44   : > { %v863_v40 = vld [vmem:[#allocation2 + $0x44] sm:$0x1]  ;;  %1449 = vmatmul.mubr.msk.bf16.gmra.mxu0 %vm544_vm4, %v1501_v33 }
  0x45   : > { %1458 = vmatprep.mubr.msk.bf16.mxu1 %vm544_vm4, %v1374_v36  ;;  %v970_v41 = vrot.slane %v969_v39, 4  ;;  %v972_v42 = vshll.u32 %v863_v40, 16  ;;  %v961_v43 = vsel %vm1645_vm7, %v956_v37, %v960_v38 }
  0x47   : > { %v974_v44 = vrot.slane %v972_v42, 5 }
  0x49   : > { %v975_v45 = vsel %vm1645_vm7, %v970_v41, %v974_v44 }
  0x4a   : > { %v1375_v46 = vcombine.low %v961_v43, %v975_v45 }
  0x4c   : > { %1459 = vmatmul.mubr.msk.bf16.gmra.mxu1 %vm544_vm4, %v1375_v46 }
  0xe2   : > { %v1436_v48 = vpop.f32.mrf.mxu1 }
  0xe4   : > { %v694_v49 = vpop.f32.mrf.mxu1 }
  0xe6   : > { %v1437_v50 = vpop.f32.mrf.mxu1 }
  0xe8   : > { %v697_v52 = vpop.f32.mrf.mxu1 }
  0xea   : > { %v1426_v51 = vpop.f32.mrf.mxu0 }
  0xeb   : > { %v703_v62 = vadd.f32 %v1436_v48, %v1426_v51 }
  0xec   : > { %v591_v53 = vpop.f32.mrf.mxu0  ;;  %v1440_v55 = vpop.f32.mrf.mxu1 }
  0xed   : > { %v695_v1 = vadd.f32 %v694_v49, %v591_v53 }
  0xee   : > { %v1427_v54 = vpop.f32.mrf.mxu0  ;;  %v710_v57 = vpop.f32.mrf.mxu1 }
  0xef   : > { %v706_v8 = vadd.f32 %v1437_v50, %v1427_v54 }
  0xf0   : > { %v594_v56 = vpop.f32.mrf.mxu0  ;;  %v1441_v59 = vpop.f32.mrf.mxu1 }
  0xf1   : > { %v698_v12 = vadd.f32 %v697_v52, %v594_v56 }
  0xf2   : > { %v713_v63 = vpop.f32.mrf.mxu1 }
  0xf4   : > { %v1430_v3 = vpop.f32.mrf.mxu0 }
  0xf5   : > { %v719_v27 = vadd.f32 %v1440_v55, %v1430_v3 }
  0xf6   : > { %v607_v58 = vpop.f32.mrf.mxu0 }
  0xf7   : > { %v711_v33 = vadd.f32 %v710_v57, %v607_v58 }
  0xf8   : > { %v1431_v60 = vpop.f32.mrf.mxu0 }
  0xf9   : > { %v722_v43 = vadd.f32 %v1441_v59, %v1431_v60 }
  0xfa   : > { %v610_v61 = vpop.f32.mrf.mxu0 }
  0xfb   : > { %v714_v47 = vadd.f32 %v713_v63, %v610_v61 }
  0xfc   : > { %v1446_v0 = vpop.f32.mrf.mxu0 }
  0xfd   : > { %v842_v4 = vadd.f32 %v1446_v0, %v703_v62 }
  0xfe   : > { %v809_v7 = vpop.f32.mrf.mxu0 }
  0xff   : > { %v840_v9 = vadd.f32 %v809_v7, %v695_v1 }
 0x100   : > { %v1456_v2 = vpop.f32.mrf.mxu1  ;;  %v1447_v11 = vpop.f32.mrf.mxu0 }
 0x101   : > { %v1076_v10 = vadd.f32 %v1456_v2, %v842_v4  ;;  %v843_v14 = vadd.f32 %v1447_v11, %v706_v8 }
 0x102   : > { %v1043_v13 = vpop.f32.mrf.mxu1  ;;  %v812_v17 = vpop.f32.mrf.mxu0 }
 0x103   : > { %v1396_v15 = vpack.c.bf16 %v1076_v10, %v1076_v10  ;;  %v1074_v16 = vadd.f32 %v1043_v13, %v840_v9  ;;  %v841_v19 = vadd.f32 %v812_v17, %v698_v12  ;;  %v1152_v28 = vmul.f32 %v1076_v10, %v1076_v10 }
 0x104   : > { %v1457_v18 = vpop.f32.mrf.mxu1  ;;  %v1450_v21 = vpop.f32.mrf.mxu0  ;;  %v1128_v36 = vsel %vm1124_vm10, %v1076_v10, 0.0 }
 0x105   : > { %1117 = vst.msk [vmem:[%s1711_s12 + $0x8] sm:$0xf] %vm1114_vm9, %v1396_v15  ;;  %v1394_v20 = vpack.c.bf16 %v1074_v16, %v1074_v16  ;;  %v1077_v23 = vadd.f32 %v1457_v18, %v843_v14  ;;  %v1150_v24 = vmul.f32 %v1074_v16, %v1074_v16  ;;  %v1125_v29 = vsel %vm1124_vm10, %v1074_v16, 0.0 }
 0x106   : > { %v1046_v22 = vpop.f32.mrf.mxu1  ;;  %v825_v26 = vpop.f32.mrf.mxu0  ;;  %v846_v35 = vadd.f32 %v1450_v21, %v719_v27  ;;  %v1161_v44 = vsel %vm1124_vm10, %v1152_v28, 0.0 }
 0x107   : > { %1115 = vst.msk [vmem:[%s1711_s12] sm:$0xf] %vm1114_vm9, %v1394_v20  ;;  %v1075_v25 = vadd.f32 %v1046_v22, %v841_v19  ;;  %v1397_v6 = vpack.c.bf16 %v1077_v23, %v1077_v23  ;;  %v1158_v37 = vsel %vm1124_vm10, %v1150_v24, 0.0  ;;  %v1153_v39 = vmul.f32 %v1077_v23, %v1077_v23 }
 0x108   : > { %v1451_v32 = vpop.f32.mrf.mxu0  ;;  %v844_v42 = vadd.f32 %v825_v26, %v711_v33  ;;  %v1130_v48 = vsel %vm1124_vm10, %v1077_v23, 0.0 }
 0x109   : > { %v1395_v30 = vpack.c.bf16 %v1075_v25, %v1075_v25  ;;  %v1126_v31 = vsel %vm1124_vm10, %v1075_v25, 0.0  ;;  %v1151_v5 = vmul.f32 %v1075_v25, %v1075_v25  ;;  %1118 = vst.msk [vmem:[%s1711_s12 + $0xc] sm:$0xf] %vm1114_vm9, %v1397_v6  ;;  %v847_v53 = vadd.f32 %v1451_v32, %v722_v43 }
 0x10a   : > { %v1127_v34 = vadd.f32 %v1126_v31, %v1125_v29  ;;  %v828_v46 = vpop.f32.mrf.mxu0  ;;  %v1163_v54 = vsel %vm1124_vm10, %v1153_v39, 0.0 }
 0x10b   : > { %1116 = vst.msk [vmem:[%s1711_s12 + $0x4] sm:$0xf] %vm1114_vm9, %v1395_v30  ;;  %v1159_v38 = vsel %vm1124_vm10, %v1151_v5, 0.0  ;;  %v845_v57 = vadd.f32 %v828_v46, %v714_v47  ;;  %v1123_v5 = vld [vmem:[#allocation3] sm:$0x1] }
 0x10c   : > { %v1129_v40 = vadd.f32 %v1128_v36, %v1127_v34  ;;  %v1160_v41 = vadd.f32 %v1159_v38, %v1158_v37  ;;  %v1460_v45 = vpop.f32.mrf.mxu1  ;;  %v1149_v34 = vld [vmem:[#allocation3 + $0x1] sm:$0x1] }
 0x10d   : > { %v1080_v50 = vadd.f32 %v1460_v45, %v846_v35 }
 0x10e   : > { %v1162_v49 = vadd.f32 %v1161_v44, %v1160_v41  ;;  %v1059_v51 = vpop.f32.mrf.mxu1  ;;  %v1131_v52 = vadd.f32 %v1130_v48, %v1129_v40 }
 0x10f   : > { %v1400_v55 = vpack.c.bf16 %v1080_v50, %v1080_v50  ;;  %v1078_v56 = vadd.f32 %v1059_v51, %v844_v42  ;;  %v1156_v2 = vmul.f32 %v1080_v50, %v1080_v50  ;;  %v1136_v13 = vsel %vm1124_vm10, %v1080_v50, 0.0 }
 0x110   : > { %v1461_v3 = vpop.f32.mrf.mxu1  ;;  %v1164_v58 = vadd.f32 %v1163_v54, %v1162_v49 }
 0x111   : > { %1121 = vst.msk [vmem:[%s1711_s12 + $0x18] sm:$0xf] %vm1114_vm9, %v1400_v55  ;;  %v1398_v59 = vpack.c.bf16 %v1078_v56, %v1078_v56  ;;  %v1132_v60 = vsel %vm1124_vm10, %v1078_v56, 0.0  ;;  %v1154_v61 = vmul.f32 %v1078_v56, %v1078_v56  ;;  %v1081_v0 = vadd.f32 %v1461_v3, %v847_v53 }
 0x112   : > { %v1133_v62 = vadd.f32 %v1132_v60, %v1131_v52  ;;  %v1062_v63 = vpop.f32.mrf.mxu1  ;;  %v1169_v18 = vsel %vm1124_vm10, %v1156_v2, 0.0 }
 0x113   : > { %1119 = vst.msk [vmem:[%s1711_s12 + $0x10] sm:$0xf] %vm1114_vm9, %v1398_v59  ;;  %v1165_v1 = vsel %vm1124_vm10, %v1154_v61, 0.0  ;;  %v1079_v4 = vadd.f32 %v1062_v63, %v845_v57  ;;  %v1401_v8 = vpack.c.bf16 %v1081_v0, %v1081_v0  ;;  %v1157_v14 = vmul.f32 %v1081_v0, %v1081_v0 }
 0x114   : > { %v1166_v7 = vadd.f32 %v1165_v1, %v1164_v58  ;;  %v1138_v19 = vsel %vm1124_vm10, %v1081_v0, 0.0 }
 0x115   : > { %v1399_v9 = vpack.c.bf16 %v1079_v4, %v1079_v4  ;;  %v1134_v10 = vsel %vm1124_vm10, %v1079_v4, 0.0  ;;  %v1155_v11 = vmul.f32 %v1079_v4, %v1079_v4  ;;  %1122 = vst.msk [vmem:[%s1711_s12 + $0x1c] sm:$0xf] %vm1114_vm9, %v1401_v8  ;;  %v1171_v22 = vsel %vm1124_vm10, %v1157_v14, 0.0 }
 0x116   : > { %v1135_v12 = vadd.f32 %v1134_v10, %v1133_v62 }
 0x117   : > { %1120 = vst.msk [vmem:[%s1711_s12 + $0x14] sm:$0xf] %vm1114_vm9, %v1399_v9  ;;  %v1167_v15 = vsel %vm1124_vm10, %v1155_v11, 0.0 }
 0x118   : > { %v1137_v16 = vadd.f32 %v1136_v13, %v1135_v12  ;;  %v1168_v17 = vadd.f32 %v1167_v15, %v1166_v7 }
 0x11a   : > { %v1139_v20 = vadd.f32 %v1138_v19, %v1137_v16  ;;  %v1170_v21 = vadd.f32 %v1169_v18, %v1168_v17 }
 0x11c   : > { %v1140_v23 = vrot.slane %v1139_v20, 4  ;;  %v1172_v24 = vadd.f32 %v1171_v22, %v1170_v21 }
 0x11e   : > { %v1141_v25 = vadd.f32 %v1140_v23, %v1139_v20  ;;  %v1173_v26 = vrot.slane %v1172_v24, 4 }
 0x120   : > { %v1142_v27 = vrot.slane %v1141_v25, 2  ;;  %v1174_v28 = vadd.f32 %v1173_v26, %v1172_v24 }
 0x122   : > { %v1143_v6 = vadd.f32 %v1142_v27, %v1141_v25  ;;  %v1175_v29 = vrot.slane %v1174_v28, 2 }
 0x124   : > { %v1144_v30 = vrot.slane %v1143_v6, 1  ;;  %v1176_v31 = vadd.f32 %v1175_v29, %v1174_v28 }
 0x126   : > { %v1145_v32 = vadd.f32 %v1144_v30, %v1143_v6  ;;  %v1177_v33 = vrot.slane %v1176_v31, 1 }
 0x128   : > { %v1146_v35 = vadd.f32 %v1145_v32, %v1123_v5  ;;  %v1178_v36 = vadd.f32 %v1177_v33, %v1176_v31 }
 0x12a   : > { %1148 = vst.msk [vmem:[#allocation3] sm:$0x1] %vm1147_vm11, %v1146_v35  ;;  %v1179_v37 = vadd.f32 %v1178_v36, %v1149_v34 }
 0x12c   : > { %1180 = vst.msk [vmem:[#allocation3 + $0x1] sm:$0x1] %vm1147_vm11, %v1179_v37 }
 0x133   : > { %v1184_v38 = vld [vmem:[#allocation3] sm:$0x3] }
 0x134   : > { %1186 = vst.msk [vmem:[%s323_s20] sm:$0x3] %vm329_vm8, %v1184_v38 }
 0x135 PF: > { %s15_s17 = sadd.s32 1, %s1524_s17   ;;  %s1768_s15 = smov %s1520_s16 }
 0x136   : > { %p12_p5 = scmp.ge.s32.totalorder %s15_s17, 4   ;;  %s1769_s16 = smov %s1771_s18 }
 0x138   :  { %14 = sbr.rel (!%p12_p5) target bundleno = 2 (0x2), region = 90 }

</bundles_post_ra>
